<compile_context>
chip_gen: v7x
topology: tpu7x:2x2x1
jax: 0.10.0
libtpu: 0.0.40
codegen_flags: <defaults>
</compile_context>

<pallas_src>
import jax
import jax.numpy as jnp
from jax.experimental import pallas as pl
from jax.experimental.pallas import tpu as pltpu

EPS = 1e-5  # InstanceNorm2d default eps


def _round_up(v, m):
    return ((v + m - 1) // m) * m


def _make_kernel(k, p, H, W, C_in, P0, mm_dtype):
    """Fused conv + instance-norm + PReLU kernel body (one image per grid step)."""
    L = H * W
    KK = k * k
    inv_cnt = 1.0 / float(L)

    def kernel(x_ref, w_ref, a_ref, coords_ref, o_ref, xs_ref, st_ref):
        # x_ref:      (1, C_in, L)      one image, flat NCHW spatial, f32
        # w_ref:      (C_out, KK*C_in)  stacked conv weights, f32
        # a_ref:      (C_out, 1)        PReLU per-channel alpha, f32
        # coords_ref: (2, L) int32      [row index; col index] per output lane
        # o_ref:      (1, C_out, L)     compact, lane-dense flat output
        # xs_ref:     (C_in, Lp) f32    scratch: image staged at lane offset P0
        # st_ref:     (KK*C_in, L) f32  scratch: stacked, boundary-masked taps
        ho = coords_ref[0:1, :]                       # (1, L) int32
        wo = coords_ref[1:2, :]

        # Stage the image once at a 128-aligned lane offset so every tap slice
        # below is in-bounds.  The pad lanes hold garbage but are never read
        # unmasked (see boundary masks); jnp.where keeps them NaN-safe.
        xs_ref[:, P0:P0 + L] = x_ref[0]

        # Build the (KK*C_in, L) stacked operand: tap (ky,kx) is the image
        # shifted by d = (ky-p)*W + (kx-p) lanes, with out-of-image positions
        # zeroed -- exactly Conv2d zero padding for the "same" case 2p == k-1.
        for ky in range(k):
            dy = ky - p
            for kx in range(k):
                dx = kx - p
                d = dy * W + dx
                slab = xs_ref[:, P0 + d:P0 + d + L]   # (C_in, L)
                conds = []
                if dy < 0:
                    conds.append(ho >= -dy)
                elif dy > 0:
                    conds.append(ho < H - dy)
                if dx < 0:
                    conds.append(wo >= -dx)
                elif dx > 0:
                    conds.append(wo < W - dx)
                if conds:
                    m = conds[0]
                    for c in conds[1:]:
                        m = m & c
                    slab = jnp.where(m, slab, 0.0)
                t = ky * k + kx
                st_ref[t * C_in:(t + 1) * C_in, :] = slab

        # Single MXU contraction over K = k*k*C_in (f32 accumulation).
        st = st_ref[...]
        w = w_ref[...]
        if mm_dtype != jnp.float32:
            st = st.astype(mm_dtype)
            w = w.astype(mm_dtype)
        acc = jnp.dot(w, st, preferred_element_type=jnp.float32)  # (C_out, L)

        # InstanceNorm2d (affine=False, biased variance), two-pass statistics.
        mean = jnp.sum(acc, axis=-1, keepdims=True) * inv_cnt
        cen = acc - mean
        var = jnp.sum(cen * cen, axis=-1, keepdims=True) * inv_cnt
        xhat = cen * jax.lax.rsqrt(var + EPS)

        # PReLU with per-channel alpha.
        alpha = a_ref[...]
        y = jnp.where(xhat >= 0.0, xhat, alpha * xhat)
        o_ref[0] = y.astype(o_ref.dtype)

    return kernel


def conv_in_forward(x, weight, bias, alpha, k, s, p,
                    matmul_dtype=jnp.float32, out_dtype=jnp.float32):
    """x: (N, C_in, H, W) f32 -> PReLU(InstanceNorm2d(Conv2d(x))), (N, C_out, H, W).

    `bias` is accepted for API parity with the PyTorch module but unused: a
    per-channel conv bias is cancelled exactly by InstanceNorm2d(affine=False).
    """
    del bias
    if s != 1 or 2 * p != k - 1:
        # TODO(synk): general stride / non-"same" padding needs a Wp-strided
        # layout with output compaction; only the canonical s=1, 2p=k-1 case is
        # implemented in the fused kernel.
        raise NotImplementedError(
            "fused Conv_In kernel assumes stride 1 and 'same' padding (2p == k-1)")

    N, C_in, H, W = x.shape
    C_out = weight.shape[0]
    KK = k * k
    L = H * W                               # compact flat spatial length (== out size)
    P0 = _round_up(p * W + p, 128)          # 128-aligned staging offset >= max |tap shift|
    Lp = _round_up(P0 + L + p * W + p, 128)  # staging buffer length

    # Free, contiguous reshape only -- no pad / cast passes over x in HBM.
    xflat = x.reshape(N, C_in, L)

    # (C_out, k*k*C_in): column t*C_in + c holds weight[o, c, ky, kx], t = ky*k + kx.
    w_stacked = jnp.transpose(weight, (0, 2, 3, 1)).reshape(C_out, KK * C_in)
    w_stacked = w_stacked.astype(jnp.float32)
    a2 = alpha.reshape(C_out, 1).astype(jnp.float32)

    # Per-lane (row, col) output coordinates for the in-kernel boundary masks
    # (tiny, constant across the grid; avoids vector int div/mod in-kernel).
    q = jnp.arange(L, dtype=jnp.int32)
    coords = jnp.stack([q // W, q % W], axis=0)       # (2, L) int32

    kernel = _make_kernel(k, p, H, W, C_in, P0, matmul_dtype)

    out_flat = pl.pallas_call(
        kernel,
        out_shape=jax.ShapeDtypeStruct((N, C_out, L), out_dtype),
        grid=(N,),                                    # one image per grid step
        in_specs=[
            pl.BlockSpec((1, C_in, L), lambda b: (b, 0, 0)),
            pl.BlockSpec((C_out, KK * C_in), lambda b: (0, 0)),
            pl.BlockSpec((C_out, 1), lambda b: (0, 0)),
            pl.BlockSpec((2, L), lambda b: (0, 0)),
        ],
        out_specs=pl.BlockSpec((1, C_out, L), lambda b: (b, 0, 0)),
        scratch_shapes=[
            pltpu.VMEM((C_in, Lp), jnp.float32),      # staged image (pad lanes masked)
            pltpu.VMEM((KK * C_in, L), jnp.float32),  # stacked conv taps
        ],
        # Per-step VMEM footprint is ~O(100 KiB) at these shapes, well inside the
        # default scoped VMEM on v5e/v6e/v7x; raise vmem_limit_bytes when scaling H*W.
        compiler_params=pltpu.CompilerParams(dimension_semantics=("parallel",)),
    )(xflat, w_stacked, a2, coords)

    # Contiguous, so this reshape is free (no HBM compaction pass).
    return out_flat.reshape(N, C_out, H, W)


def conv_in_reference(x, weight, bias, alpha, k, s, p):
    """Pure-JAX reference of the PyTorch forward (conv -> InstanceNorm -> PReLU)."""
    y = jax.lax.conv_general_dilated(
        x, weight, window_strides=(s, s), padding=((p, p), (p, p)),
        dimension_numbers=("NCHW", "OIHW", "NCHW"))
    y = y + bias.reshape(1, -1, 1, 1)
    mean = y.mean(axis=(2, 3), keepdims=True)
    var = y.var(axis=(2, 3), keepdims=True)      # biased, like InstanceNorm2d
    yn = (y - mean) / jnp.sqrt(var + EPS)
    a = alpha.reshape(1, -1, 1, 1)
    return jnp.where(yn >= 0.0, yn, a * yn)


if __name__ == "__main__":
    # Module config: Conv_In(in_ch=4, out_ch=8, k=3, s=1, p=1)
    in_ch, out_ch, k, s, p = 4, 8, 3, 1, 1
    N, H, W = 2, 16, 16

    key = jax.random.PRNGKey(0)
    kx_, kw_, kb_ = jax.random.split(key, 3)

    x = jax.random.normal(kx_, (N, in_ch, H, W), dtype=jnp.float32)

    # Deterministic parameter init (Conv2d-style uniform bound; PReLU alpha = 0.25)
    fan_in = in_ch * k * k
    bound = 1.0 / (fan_in ** 0.5)
    weight = jax.random.uniform(kw_, (out_ch, in_ch, k, k),
                                minval=-bound, maxval=bound, dtype=jnp.float32)
    bias = jax.random.uniform(kb_, (out_ch,),
                              minval=-bound, maxval=bound, dtype=jnp.float32)
    alpha = jnp.full((out_ch,), 0.25, dtype=jnp.float32)

    ref = conv_in_reference(x, weight, bias, alpha, k, s, p)

    # f32 MXU operand path (matches the reference tightly).
    out = conv_in_forward(x, weight, bias, alpha, k, s, p)
    out = jax.block_until_ready(out)
    assert out.shape == ref.shape == (N, out_ch, H, W)
    err = float(jnp.max(jnp.abs(out - ref)))
    assert err < 1e-4, f"f32 max abs err {err}"

    # bf16 MXU operands (f32 accumulate, f32 norm/PReLU epilogue).
    out_bf16 = conv_in_forward(x, weight, bias, alpha, k, s, p,
                               matmul_dtype=jnp.bfloat16)
    out_bf16 = jax.block_until_ready(out_bf16)
    err_bf16 = float(jnp.max(jnp.abs(out_bf16 - ref)))
    assert err_bf16 < 5e-2, f"bf16 matmul max abs err {err_bf16}"

    # bf16 output store (halves the dominant HBM writeback stream).
    out_bf16o = conv_in_forward(x, weight, bias, alpha, k, s, p,
                                out_dtype=jnp.bfloat16)
    out_bf16o = jax.block_until_ready(out_bf16o)
    err_bf16o = float(jnp.max(jnp.abs(out_bf16o.astype(jnp.float32) - ref)))
    assert err_bf16o < 5e-2, f"bf16 output max abs err {err_bf16o}"

    print("KERNEL_OK")
</pallas_src>

<mosaic_0001>
module attributes {stable_mosaic.version = 11 : i64} {
  func.func @kernel(%arg0: i32, %arg1: memref<1x4x256xf32, #tpu.memory_space<vmem>>, %arg2: memref<8x36xf32, #tpu.memory_space<vmem>>, %arg3: memref<8x1xf32, #tpu.memory_space<vmem>>, %arg4: memref<2x256xi32, #tpu.memory_space<vmem>>, %arg5: memref<1x8x256xf32, #tpu.memory_space<vmem>>, %arg6: memref<4x512xf32, #tpu.memory_space<vmem>>, %arg7: memref<36x256xf32, #tpu.memory_space<vmem>>) attributes {dimension_semantics = [#tpu.dimension_semantics<parallel>], iteration_bounds = array<i64: 2>, scalar_prefetch = 0 : i64, scratch_operands = 2 : i64, tpu.core_type = #tpu.core_type<tc>, window_params = [{transform_indices = @transform_0, window_bounds = array<i64: 1, 4, 256>}, {pipeline_mode = #tpu.pipeline_mode<synchronous>, transform_indices = @transform_1, window_bounds = array<i64: 8, 36>}, {pipeline_mode = #tpu.pipeline_mode<synchronous>, transform_indices = @transform_2, window_bounds = array<i64: 8, 1>}, {pipeline_mode = #tpu.pipeline_mode<synchronous>, transform_indices = @transform_3, window_bounds = array<i64: 2, 256>}, {transform_indices = @transform_4, window_bounds = array<i64: 1, 8, 256>}]} {
    %c0 = arith.constant 0 : index
    %c0_0 = arith.constant 0 : index
    %0 = vector.load %arg4[%c0, %c0_0] : memref<2x256xi32, #tpu.memory_space<vmem>>, vector<1x256xi32>
    %c1 = arith.constant 1 : index
    %c0_1 = arith.constant 0 : index
    %1 = vector.load %arg4[%c1, %c0_1] : memref<2x256xi32, #tpu.memory_space<vmem>>, vector<1x256xi32>
    %c0_2 = arith.constant 0 : index
    %c0_3 = arith.constant 0 : index
    %c0_4 = arith.constant 0 : index
    %2 = vector.load %arg1[%c0_2, %c0_3, %c0_4] : memref<1x4x256xf32, #tpu.memory_space<vmem>>, vector<1x4x256xf32>
    %3 = vector.shape_cast %2 : vector<1x4x256xf32> to vector<4x256xf32>
    %c0_5 = arith.constant 0 : index
    %c128 = arith.constant 128 : index
    %4 = vector.load %arg6[%c0_5, %c128] : memref<4x512xf32, #tpu.memory_space<vmem>>, vector<4x256xf32>
    tpu.vector_store %arg6[%c0_5, %c128], %3 {strides = array<i32>} : memref<4x512xf32, #tpu.memory_space<vmem>>, vector<4x256xf32>,
    %c0_6 = arith.constant 0 : index
    %c111 = arith.constant 111 : index
    %5 = vector.load %arg6[%c0_6, %c111] : memref<4x512xf32, #tpu.memory_space<vmem>>, vector<4x256xf32>
    %c1_i32 = arith.constant 1 : i32
    %6 = vector.broadcast %c1_i32 : i32 to vector<1x256xi32>
    %7 = arith.cmpi sge, %0, %6 : vector<1x256xi32>
    %c1_i32_7 = arith.constant 1 : i32
    %8 = vector.broadcast %c1_i32_7 : i32 to vector<1x256xi32>
    %9 = arith.cmpi sge, %1, %8 : vector<1x256xi32>
    %10 = arith.andi %7, %9 : vector<1x256xi1>
    %cst = arith.constant 0.000000e+00 : f32
    %11 = vector.shape_cast %10 : vector<1x256xi1> to vector<1x256xi1>
    %12 = vector.broadcast %11 : vector<1x256xi1> to vector<4x256xi1>
    %13 = vector.broadcast %cst : f32 to vector<4x256xf32>
    %14 = arith.select %12, %5, %13 : vector<4x256xi1>, vector<4x256xf32>
    %c0_8 = arith.constant 0 : index
    %c0_9 = arith.constant 0 : index
    %15 = vector.load %arg7[%c0_8, %c0_9] : memref<36x256xf32, #tpu.memory_space<vmem>>, vector<4x256xf32>
    tpu.vector_store %arg7[%c0_8, %c0_9], %14 {strides = array<i32>} : memref<36x256xf32, #tpu.memory_space<vmem>>, vector<4x256xf32>,
    %c0_10 = arith.constant 0 : index
    %c112 = arith.constant 112 : index
    %16 = vector.load %arg6[%c0_10, %c112] : memref<4x512xf32, #tpu.memory_space<vmem>>, vector<4x256xf32>
    %c1_i32_11 = arith.constant 1 : i32
    %17 = vector.broadcast %c1_i32_11 : i32 to vector<1x256xi32>
    %18 = arith.cmpi sge, %0, %17 : vector<1x256xi32>
    %cst_12 = arith.constant 0.000000e+00 : f32
    %19 = vector.shape_cast %18 : vector<1x256xi1> to vector<1x256xi1>
    %20 = vector.broadcast %19 : vector<1x256xi1> to vector<4x256xi1>
    %21 = vector.broadcast %cst_12 : f32 to vector<4x256xf32>
    %22 = arith.select %20, %16, %21 : vector<4x256xi1>, vector<4x256xf32>
    %c4 = arith.constant 4 : index
    %c0_13 = arith.constant 0 : index
    %23 = vector.load %arg7[%c4, %c0_13] : memref<36x256xf32, #tpu.memory_space<vmem>>, vector<4x256xf32>
    tpu.vector_store %arg7[%c4, %c0_13], %22 {strides = array<i32>} : memref<36x256xf32, #tpu.memory_space<vmem>>, vector<4x256xf32>,
    %c0_14 = arith.constant 0 : index
    %c113 = arith.constant 113 : index
    %24 = vector.load %arg6[%c0_14, %c113] : memref<4x512xf32, #tpu.memory_space<vmem>>, vector<4x256xf32>
    %c1_i32_15 = arith.constant 1 : i32
    %25 = vector.broadcast %c1_i32_15 : i32 to vector<1x256xi32>
    %26 = arith.cmpi sge, %0, %25 : vector<1x256xi32>
    %c15_i32 = arith.constant 15 : i32
    %27 = vector.broadcast %c15_i32 : i32 to vector<1x256xi32>
    %28 = arith.cmpi slt, %1, %27 : vector<1x256xi32>
    %29 = arith.andi %26, %28 : vector<1x256xi1>
    %cst_16 = arith.constant 0.000000e+00 : f32
    %30 = vector.shape_cast %29 : vector<1x256xi1> to vector<1x256xi1>
    %31 = vector.broadcast %30 : vector<1x256xi1> to vector<4x256xi1>
    %32 = vector.broadcast %cst_16 : f32 to vector<4x256xf32>
    %33 = arith.select %31, %24, %32 : vector<4x256xi1>, vector<4x256xf32>
    %c8 = arith.constant 8 : index
    %c0_17 = arith.constant 0 : index
    %34 = vector.load %arg7[%c8, %c0_17] : memref<36x256xf32, #tpu.memory_space<vmem>>, vector<4x256xf32>
    tpu.vector_store %arg7[%c8, %c0_17], %33 {strides = array<i32>} : memref<36x256xf32, #tpu.memory_space<vmem>>, vector<4x256xf32>,
    %c0_18 = arith.constant 0 : index
    %c127 = arith.constant 127 : index
    %35 = vector.load %arg6[%c0_18, %c127] : memref<4x512xf32, #tpu.memory_space<vmem>>, vector<4x256xf32>
    %c1_i32_19 = arith.constant 1 : i32
    %36 = vector.broadcast %c1_i32_19 : i32 to vector<1x256xi32>
    %37 = arith.cmpi sge, %1, %36 : vector<1x256xi32>
    %cst_20 = arith.constant 0.000000e+00 : f32
    %38 = vector.shape_cast %37 : vector<1x256xi1> to vector<1x256xi1>
    %39 = vector.broadcast %38 : vector<1x256xi1> to vector<4x256xi1>
    %40 = vector.broadcast %cst_20 : f32 to vector<4x256xf32>
    %41 = arith.select %39, %35, %40 : vector<4x256xi1>, vector<4x256xf32>
    %c12 = arith.constant 12 : index
    %c0_21 = arith.constant 0 : index
    %42 = vector.load %arg7[%c12, %c0_21] : memref<36x256xf32, #tpu.memory_space<vmem>>, vector<4x256xf32>
    tpu.vector_store %arg7[%c12, %c0_21], %41 {strides = array<i32>} : memref<36x256xf32, #tpu.memory_space<vmem>>, vector<4x256xf32>,
    %c0_22 = arith.constant 0 : index
    %c128_23 = arith.constant 128 : index
    %43 = vector.load %arg6[%c0_22, %c128_23] : memref<4x512xf32, #tpu.memory_space<vmem>>, vector<4x256xf32>
    %c16 = arith.constant 16 : index
    %c0_24 = arith.constant 0 : index
    %44 = vector.load %arg7[%c16, %c0_24] : memref<36x256xf32, #tpu.memory_space<vmem>>, vector<4x256xf32>
    tpu.vector_store %arg7[%c16, %c0_24], %43 {strides = array<i32>} : memref<36x256xf32, #tpu.memory_space<vmem>>, vector<4x256xf32>,
    %c0_25 = arith.constant 0 : index
    %c129 = arith.constant 129 : index
    %45 = vector.load %arg6[%c0_25, %c129] : memref<4x512xf32, #tpu.memory_space<vmem>>, vector<4x256xf32>
    %c15_i32_26 = arith.constant 15 : i32
    %46 = vector.broadcast %c15_i32_26 : i32 to vector<1x256xi32>
    %47 = arith.cmpi slt, %1, %46 : vector<1x256xi32>
    %cst_27 = arith.constant 0.000000e+00 : f32
    %48 = vector.shape_cast %47 : vector<1x256xi1> to vector<1x256xi1>
    %49 = vector.broadcast %48 : vector<1x256xi1> to vector<4x256xi1>
    %50 = vector.broadcast %cst_27 : f32 to vector<4x256xf32>
    %51 = arith.select %49, %45, %50 : vector<4x256xi1>, vector<4x256xf32>
    %c20 = arith.constant 20 : index
    %c0_28 = arith.constant 0 : index
    %52 = vector.load %arg7[%c20, %c0_28] : memref<36x256xf32, #tpu.memory_space<vmem>>, vector<4x256xf32>
    tpu.vector_store %arg7[%c20, %c0_28], %51 {strides = array<i32>} : memref<36x256xf32, #tpu.memory_space<vmem>>, vector<4x256xf32>,
    %c0_29 = arith.constant 0 : index
    %c143 = arith.constant 143 : index
    %53 = vector.load %arg6[%c0_29, %c143] : memref<4x512xf32, #tpu.memory_space<vmem>>, vector<4x256xf32>
    %c15_i32_30 = arith.constant 15 : i32
    %54 = vector.broadcast %c15_i32_30 : i32 to vector<1x256xi32>
    %55 = arith.cmpi slt, %0, %54 : vector<1x256xi32>
    %c1_i32_31 = arith.constant 1 : i32
    %56 = vector.broadcast %c1_i32_31 : i32 to vector<1x256xi32>
    %57 = arith.cmpi sge, %1, %56 : vector<1x256xi32>
    %58 = arith.andi %55, %57 : vector<1x256xi1>
    %cst_32 = arith.constant 0.000000e+00 : f32
    %59 = vector.shape_cast %58 : vector<1x256xi1> to vector<1x256xi1>
    %60 = vector.broadcast %59 : vector<1x256xi1> to vector<4x256xi1>
    %61 = vector.broadcast %cst_32 : f32 to vector<4x256xf32>
    %62 = arith.select %60, %53, %61 : vector<4x256xi1>, vector<4x256xf32>
    %c24 = arith.constant 24 : index
    %c0_33 = arith.constant 0 : index
    %63 = vector.load %arg7[%c24, %c0_33] : memref<36x256xf32, #tpu.memory_space<vmem>>, vector<4x256xf32>
    tpu.vector_store %arg7[%c24, %c0_33], %62 {strides = array<i32>} : memref<36x256xf32, #tpu.memory_space<vmem>>, vector<4x256xf32>,
    %c0_34 = arith.constant 0 : index
    %c144 = arith.constant 144 : index
    %64 = vector.load %arg6[%c0_34, %c144] : memref<4x512xf32, #tpu.memory_space<vmem>>, vector<4x256xf32>
    %c15_i32_35 = arith.constant 15 : i32
    %65 = vector.broadcast %c15_i32_35 : i32 to vector<1x256xi32>
    %66 = arith.cmpi slt, %0, %65 : vector<1x256xi32>
    %cst_36 = arith.constant 0.000000e+00 : f32
    %67 = vector.shape_cast %66 : vector<1x256xi1> to vector<1x256xi1>
    %68 = vector.broadcast %67 : vector<1x256xi1> to vector<4x256xi1>
    %69 = vector.broadcast %cst_36 : f32 to vector<4x256xf32>
    %70 = arith.select %68, %64, %69 : vector<4x256xi1>, vector<4x256xf32>
    %c28 = arith.constant 28 : index
    %c0_37 = arith.constant 0 : index
    %71 = vector.load %arg7[%c28, %c0_37] : memref<36x256xf32, #tpu.memory_space<vmem>>, vector<4x256xf32>
    tpu.vector_store %arg7[%c28, %c0_37], %70 {strides = array<i32>} : memref<36x256xf32, #tpu.memory_space<vmem>>, vector<4x256xf32>,
    %c0_38 = arith.constant 0 : index
    %c145 = arith.constant 145 : index
    %72 = vector.load %arg6[%c0_38, %c145] : memref<4x512xf32, #tpu.memory_space<vmem>>, vector<4x256xf32>
    %c15_i32_39 = arith.constant 15 : i32
    %73 = vector.broadcast %c15_i32_39 : i32 to vector<1x256xi32>
    %74 = arith.cmpi slt, %0, %73 : vector<1x256xi32>
    %c15_i32_40 = arith.constant 15 : i32
    %75 = vector.broadcast %c15_i32_40 : i32 to vector<1x256xi32>
    %76 = arith.cmpi slt, %1, %75 : vector<1x256xi32>
    %77 = arith.andi %74, %76 : vector<1x256xi1>
    %cst_41 = arith.constant 0.000000e+00 : f32
    %78 = vector.shape_cast %77 : vector<1x256xi1> to vector<1x256xi1>
    %79 = vector.broadcast %78 : vector<1x256xi1> to vector<4x256xi1>
    %80 = vector.broadcast %cst_41 : f32 to vector<4x256xf32>
    %81 = arith.select %79, %72, %80 : vector<4x256xi1>, vector<4x256xf32>
    %c32 = arith.constant 32 : index
    %c0_42 = arith.constant 0 : index
    %82 = vector.load %arg7[%c32, %c0_42] : memref<36x256xf32, #tpu.memory_space<vmem>>, vector<4x256xf32>
    tpu.vector_store %arg7[%c32, %c0_42], %81 {strides = array<i32>} : memref<36x256xf32, #tpu.memory_space<vmem>>, vector<4x256xf32>,
    %c0_43 = arith.constant 0 : index
    %c0_44 = arith.constant 0 : index
    %83 = vector.load %arg7[%c0_43, %c0_44] : memref<36x256xf32, #tpu.memory_space<vmem>>, vector<36x256xf32>
    %c0_45 = arith.constant 0 : index
    %c0_46 = arith.constant 0 : index
    %84 = vector.load %arg2[%c0_45, %c0_46] : memref<8x36xf32, #tpu.memory_space<vmem>>, vector<8x36xf32>
    %cst_47 = arith.constant dense<0.000000e+00> : vector<8x256xf32>
    %85 = tpu.matmul %84, %83, %cst_47 {dimension_numbers = #tpu.dot_dimension_numbers<[1], [0], [0], [1], [0, 0, 1, 1], [], []>} : vector<8x36xf32>, vector<36x256xf32>, vector<8x256xf32> -> vector<8x256xf32>
    %cst_48 = arith.constant dense<0.000000e+00> : vector<8xf32>
    %86 = vector.multi_reduction <add>, %85, %cst_48 [1] : vector<8x256xf32> to vector<8xf32>
    %87 = vector.shape_cast %86 : vector<8xf32> to vector<8x1xf32>
    %cst_49 = arith.constant 3.906250e-03 : f32
    %88 = vector.broadcast %cst_49 : f32 to vector<8x1xf32>
    %89 = arith.mulf %87, %88 : vector<8x1xf32>
    %90 = vector.broadcast %89 : vector<8x1xf32> to vector<8x256xf32>
    %91 = arith.subf %85, %90 : vector<8x256xf32>
    %92 = arith.mulf %91, %91 : vector<8x256xf32>
    %cst_50 = arith.constant dense<0.000000e+00> : vector<8xf32>
    %93 = vector.multi_reduction <add>, %92, %cst_50 [1] : vector<8x256xf32> to vector<8xf32>
    %94 = vector.shape_cast %93 : vector<8xf32> to vector<8x1xf32>
    %cst_51 = arith.constant 3.906250e-03 : f32
    %95 = vector.broadcast %cst_51 : f32 to vector<8x1xf32>
    %96 = arith.mulf %94, %95 : vector<8x1xf32>
    %cst_52 = arith.constant 9.99999974E-6 : f32
    %97 = vector.broadcast %cst_52 : f32 to vector<8x1xf32>
    %98 = arith.addf %96, %97 : vector<8x1xf32>
    %99 = math.rsqrt %98 : vector<8x1xf32>
    %100 = vector.broadcast %99 : vector<8x1xf32> to vector<8x256xf32>
    %101 = arith.mulf %91, %100 : vector<8x256xf32>
    %c0_53 = arith.constant 0 : index
    %c0_54 = arith.constant 0 : index
    %102 = vector.load %arg3[%c0_53, %c0_54] : memref<8x1xf32, #tpu.memory_space<vmem>>, vector<8x1xf32>
    %cst_55 = arith.constant 0.000000e+00 : f32
    %103 = vector.broadcast %cst_55 : f32 to vector<8x256xf32>
    %104 = arith.cmpf oge, %101, %103 : vector<8x256xf32>
    %105 = vector.broadcast %102 : vector<8x1xf32> to vector<8x256xf32>
    %106 = arith.mulf %105, %101 : vector<8x256xf32>
    %107 = arith.select %104, %101, %106 : vector<8x256xi1>, vector<8x256xf32>
    %c0_56 = arith.constant 0 : index
    %c0_57 = arith.constant 0 : index
    %c0_58 = arith.constant 0 : index
    %108 = vector.load %arg5[%c0_56, %c0_57, %c0_58] : memref<1x8x256xf32, #tpu.memory_space<vmem>>, vector<1x8x256xf32>
    %109 = vector.shape_cast %108 : vector<1x8x256xf32> to vector<8x256xf32>
    %110 = vector.shape_cast %107 : vector<8x256xf32> to vector<1x8x256xf32>
    tpu.vector_store %arg5[%c0_56, %c0_57, %c0_58], %110 {strides = array<i32>} : memref<1x8x256xf32, #tpu.memory_space<vmem>>, vector<1x8x256xf32>,
    return
  }
  func.func @transform_0(%arg0: i32) -> (i32, i32, i32) {
    %c0_i32 = arith.constant 0 : i32
    %c0_i32_0 = arith.constant 0 : i32
    %c0_i32_1 = arith.constant 0 : i32
    return %arg0, %c0_i32, %c0_i32_0 : i32, i32, i32
  }
  func.func @transform_1(%arg0: i32) -> (i32, i32) {
    %c0_i32 = arith.constant 0 : i32
    %c0_i32_0 = arith.constant 0 : i32
    %c0_i32_1 = arith.constant 0 : i32
    return %c0_i32, %c0_i32_0 : i32, i32
  }
  func.func @transform_2(%arg0: i32) -> (i32, i32) {
    %c0_i32 = arith.constant 0 : i32
    %c0_i32_0 = arith.constant 0 : i32
    %c0_i32_1 = arith.constant 0 : i32
    return %c0_i32, %c0_i32_0 : i32, i32
  }
  func.func @transform_3(%arg0: i32) -> (i32, i32) {
    %c0_i32 = arith.constant 0 : i32
    %c0_i32_0 = arith.constant 0 : i32
    %c0_i32_1 = arith.constant 0 : i32
    return %c0_i32, %c0_i32_0 : i32, i32
  }
  func.func @transform_4(%arg0: i32) -> (i32, i32, i32) {
    %c0_i32 = arith.constant 0 : i32
    %c0_i32_0 = arith.constant 0 : i32
    %c0_i32_1 = arith.constant 0 : i32
    return %arg0, %c0_i32, %c0_i32_0 : i32, i32, i32
  }
}

</mosaic_0001>

<bundles_post_ra>
// kernel: tpu_custom_call.1
= control target key start
LH: loop header
LB: loop body
LE: loop exit
PB: predicated region body
PF: predicated region fallthrough
CT: control target
= control target key end

     0   :  { %9 = vsyncpa [#allocation5], 0  ;;  %s1188_s0 = inlined_call_operand.hbm [shape: f32[2,4,256], index: 0, kind: input, shape index: {}]   ;;  %s1189_s1 = inlined_call_operand.vmem [shape: f32[8,36], index: 1, kind: input, shape index: {}]   ;;  %s1190_s2 = inlined_call_operand.vmem [shape: f32[8,1], index: 2, kind: input, shape index: {}]   ;;  %s1191_s3 = inlined_call_operand.vmem [shape: s32[2,256], index: 3, kind: input, shape index: {}]   ;;  %s1192_s4 = inlined_call_operand.hbm [shape: f32[2,8,256], index: 4, kind: output, shape index: {}]  }
   0x1   :  { %11 = vsyncpa [#allocation5 + $0x1], 0 }
   0x2   :  { %12 = vsyncpa [#allocation6], 0 }
   0x3   :  { %14 = vsyncpa [#allocation6 + $0x1], 0  ;;  %s937_s15 = smov 0   ;;  %s939_s16 = smov 0  }
   0x4   :  { %s941_s17 = smov 0   ;;  %s943_s18 = smov 0  }
   0x5 LB: > { %s958_s19 = sadd.s32 4294967295, %s898_s18   ;;  %s713_s20 = sadd.s32 4294967294, %s898_s18   ;;  %s898_s18 = sphi %s943_s18, %s1211_s18   ;;  %s894_s17 = sphi %s941_s17, %s1210_s17   ;;  %s890_s16 = sphi %s939_s16, %s1209_s16   ;;  %s886_s15 = sphi %s937_s15, %s1208_s15  }
   0x6   : > { %s962_s21 = sadd.s32 1, %s898_s18   ;;  %s27_s22 = sadd.s32 1, %s894_s17 }
   0x7   : > { %s24_s23 = ssub.s32 %s898_s18, %s962_s21  ;;  %p34_p0 = scmp.ne.s32.totalorder %s894_s17, %s890_s16 }
   0x8   : > { %p25_p1 = scmp.eq.s32.totalorder %s24_s23, 0  ;;  %p35_p2 = scmp.eq.s32.totalorder %s898_s18, 0 }
   0x9   : > { %p40_p3 = scmp.ne.s32.totalorder %s890_s16, %s886_s15  ;;  %p41_p4 = scmp.eq.s32.totalorder %s958_s19, 0 }
   0xa   : > { %s974_s24 = scalar_select %p25_p1, %s894_s17, %s27_s22  }
   0xb   : > { %p976_p5 = por %p35_p2, %p34_p0  ;;  %p980_p6 = por %p41_p4, %p40_p3 }
   0xc   : > { %p127_p7 = scmp.eq.s32.totalorder %s958_s19, 1  ;;  %p133_p8 = scmp.eq.s32.totalorder %s713_s20, 1 }
   0xd   : > { %p753_p10 = scmp.lt.s32.totalorder %s898_s18, 2  ;;  %s162_s29 = sand.u32 1, %s894_s17  }
   0xe   : > { %p987_p11 = por %p127_p7, %p34_p0  ;;  %p991_p12 = por %p133_p8, %p40_p3 }
   0xf   : > { %s731_s30 = sshll.u32 %s898_s18, 7  ;;  %s716_s5 = sshll.u32 %s162_s29, 3 }
  0x10   : > { %s1196_s27 = scalar_select %p987_p11, 1, 0 }
  0x11   : > { %s1197_s28 = scalar_select %p991_p12, 1, 0 }
  0x12   : > { %s1000_s8 = scalar_lea.hbm %s1188_s0, %s731_s30  ;;  %s166_s9 = scalar_lea.vmem [#allocation4], %s716_s5 }
  0x13   : > { %s174_s10 = sshll.u32 %s166_s9, 4  ;;  %p1004_p13 = pnand %p753_p10, %p976_p5  ;;  %s1008_s10 = int_to_ptr.vmem [resolvable:$true] %s174_s10 }
  0x14   : > { %s163_s12 = scalar_lea.sflag [#allocation5], %s162_s29  ;;  %s802_s13 = scalar_lea.hbm %s1000_s8, 128 }
  0x15   : > { %p803_p2 = scmp.ne.s32.totalorder %s1000_s8, %s802_s13  ;;  %p804_p3 = pneg %p1004_p13 }
  0x16   : > { %s807_s22 = scalar_lea.hbm %s1188_s0, 256  ;;  %p808_p5 = scmp.lt.u32.totalorder %s1000_s8, %s1188_s0 }
  0x17   : > { %p805_p4 = pnand %p804_p3, %p803_p2  ;;  %p809_p8 = scmp.lt.u32.totalorder %s807_s22, %s802_s13 }
  0x18   : > { %p811_p9 = scmp.lt.u32.totalorder %s802_s13, %s1000_s8 }
  0x19   : > { %p806_p7 = pneg %p805_p4  ;;  %p810_p10 = por %p809_p8, %p808_p5 }
  0x1b   : > { %p812_p0 = por %p811_p9, %p810_p10 }
  0x1d   : > { %p813_p1 = pnand %p812_p0, %p806_p7 }
  0x1f   : > { %816 = shalt.err (!%p813_p1)
}
  0x20   : > { %s817_s29 = scalar_lea.vmem %s1008_s10, 128  ;;  %s900_s30 = smov [#allocation4]  }
  0x21   : > { %p818_p2 = scmp.ne.s32.totalorder %s1008_s10, %s817_s29  ;;  %s822_s5 = sshll.u32 %s900_s30, 4  ;;  %s823_s5 = int_to_ptr.vmem [resolvable:$false] %s822_s5 }
  0x22   : > { %s824_s6 = scalar_lea.vmem %s823_s5, 256  ;;  %p825_p11 = scmp.lt.s32.totalorder %s1008_s10, %s823_s5 }
  0x23   : > { %p820_p4 = pnand %p818_p2, %p804_p3  ;;  %p826_p5 = scmp.lt.s32.totalorder %s824_s6, %s817_s29 }
  0x25   : > { %p821_p12 = pneg %p820_p4  ;;  %p827_p8 = por %p826_p5, %p825_p11 }
  0x27   : > { %p828_p9 = pnand %p827_p8, %p821_p12 }
  0x29   : > { %831 = shalt.err (!%p828_p9)
}
  0x2a   : > { %748 = dma.hbm_to_vmem [thread:$0]  (!%p1004_p13), %s1000_s8, 128, %s1008_s10, %s163_s12  }
  0x2b   : > { %p1199_p0 = scmp.lt.s32.totalorder %s898_s18, 3  ;;  %p1200_p1 = scmp.ge.s32.totalorder %s898_s18, 1 }
  0x2d   : > { %p180_p3 = pnand %p1200_p1, %p1199_p0 }
  0x2e   : > { %s1042_s7 = sand.u32 (!%p180_p3), 1, %s890_s16  }
  0x2f   : > { %183 = sbr.rel (%p180_p3) target bundleno = 778 (0x30a), region = 36  ;;  %s720_s9 = sshll.u32 (!%p180_p3), %s1042_s7, 3 }
  0x30   : > { %s186_s13 = scalar_lea.sflag (!%p180_p3), [#allocation5], %s1042_s7  ;;  %s189_s14 = scalar_lea.vmem (!%p180_p3), [#allocation4], %s720_s9 }
  0x36   : > { %877 = dma.done.wait (%p980_p6), %s186_s13, 128  }
  0x37   : > { %879 = vsyncadd (%p980_p6), %s186_s13, 4294967168  ;;  %v217_v0 = vld [vmem:[%s189_s14] sm:$0xff]  ;;  %v901_v1 = vmov 0   ;;  %s902_s8 = smov 1   ;;  %s903_s10 = smov 16   ;;  %v910_v13 = vmov 0.0   ;;  %v225_v14 = vlaneseq }
  0x38   : > { %797 = vset.pattern.permute.xlu0 %v901_v1  ;;  %218 = vst [vmem:[#allocation2 + $0x4] sm:$0xff] %v217_v0  ;;  %v381_v2 = vcombine.high %v217_v0, %v217_v0  ;;  %364 = vst [vmem:[#allocation3 + $0x20] sm:$0xf] %v217_v0  ;;  %s904_s26 = smov 17   ;;  %s905_s11 = smov 15   ;;  %591 = vmatprep.mubr.f32.mxu0 %v910_v13  ;;  %vm275_vm5 = vcmask 130048  }
  0x39   : > { %v367_v9 = vld [vmem:[#allocation2 + $0xc] sm:$0xf]  ;;  %s906_s12 = smov 127   ;;  %s907_s20 = smov 112   ;;  %v226_v17 = vshrl.u32 %v225_v14, 7  ;;  %vm244_vm8 = vcmask 138240  }
  0x3a   : > { %365 = vst [vmem:[#allocation3 + $0x28] sm:$0xf] %v381_v2  ;;  %v437_v10 = vld [vmem:[#allocation2 + $0xc] sm:$0xf]  ;;  %s908_s22 = smov 113   ;;  %s909_s23 = smov 111  }
  0x3b   : > { %v404_v11 = vld [vmem:[#allocation2 + $0xc] sm:$0xf]  ;;  %v1054_v15 = vld [vmem:[%s1191_s3] ss:$2 sm:$0x3]  ;;  %v1063_v18 = vsub.s32 0, %v226_v17 }
  0x3c   : > { %v474_v12 = vld [vmem:[#allocation2 + $0xc] sm:$0xf]  ;;  %v1059_v16 = vld [vmem:[%s1191_s3 + $0x1] ss:$2 sm:$0x3]  ;;  %vm221_vm0 = vcmp.ge.s32.totalorder %v1054_v15, 1 }
  0x3d   : > { %vm222_vm1 = vcmp.ge.s32.totalorder %v1059_v16, 1  ;;  %v1065_v19 = vsub.s32 1, %v226_v17  ;;  %v255_v22 = vsel %vm221_vm0, 1, %v901_v1  ;;  %vm292_vm3 = vcmp.lt.s32.totalorder %v1059_v16, 15  ;;  %p1205_p11 = scmp.ne.s32.totalorder %s1196_s27, 0  ;;  %s911_s25 = smov [#allocation7]  }
  0x3e   : > { %vm223_vm2 = vmand %vm221_vm0, %vm222_vm1  ;;  %v259_v23 = vrot.slane %v255_v22, %v1063_v18  ;;  %v325_v29 = vsel %vm222_vm1, 1, %v901_v1  ;;  %vm345_vm10 = vcmask 7168   ;;  %vm314_vm11 = vcmask 121856   ;;  %s836_s29 = sshll.u32 %s911_s25, 4  ;;  %s837_s29 = int_to_ptr.vmem [resolvable:$false] %s836_s29 }
  0x3f   : > { %v324_v3 = vld [vmem:[#allocation2 + $0x8] sm:$0xf]  ;;  %v323_v5 = vld [vmem:[#allocation2] sm:$0xff]  ;;  %v263_v24 = vrot.slane %v255_v22, %v1065_v19  ;;  %v224_v25 = vsel %vm223_vm2, 1, %v901_v1  ;;  %vm293_vm4 = vmand %vm221_vm0, %vm292_vm3  ;;  %v329_v37 = vrot.slane %v325_v29, %v1063_v18  ;;  %v333_v40 = vrot.slane %v325_v29, %v1065_v19  ;;  %s838_s30 = scalar_lea.vmem %s837_s29, 512 }
  0x40   : > { %v254_v4 = vld [vmem:[#allocation2 + $0x8] sm:$0xf]  ;;  %343 = vrot.lane.b32.xlu1 %v324_v3, %s902_s8  ;;  %v338_v6 = vcombine.high %v323_v5, %v323_v5  ;;  %v232_v28 = vrot.slane %v224_v25, %v1065_v19  ;;  %vm264_vm6 = vcmp.eq.s32.totalorder %v259_v23, 1  ;;  %v294_v32 = vsel %vm293_vm4, 1, %v901_v1 }
  0x41   : > { %273 = vrot.lane.b32.xlu0 %v254_v4, %s903_s10  ;;  %v220_v7 = vld [vmem:[#allocation2 + $0x8] sm:$0xf]  ;;  %vm265_vm7 = vcmp.eq.s32.totalorder %v263_v24, 1  ;;  %v302_v41 = vrot.slane %v294_v32, %v1065_v19  ;;  %v298_v46 = vrot.slane %v294_v32, %v1063_v18  ;;  %vm334_vm12 = vcmp.eq.s32.totalorder %v329_v37, 1 }
  0x42   : > { %v291_v8 = vld [vmem:[#allocation2 + $0x8] sm:$0xf]  ;;  %vm234_vm9 = vcmp.eq.s32.totalorder %v232_v28, 1  ;;  %vm335_vm13 = vcmp.eq.s32.totalorder %v333_v40, 1  ;;  %v228_v47 = vrot.slane %v224_v25, %v1063_v18  ;;  %v368_v50 = vsel %vm292_vm3, 1, %v901_v1 }
  0x43   : > { %vm304_vm14 = vcmp.eq.s32.totalorder %v302_v41, 1  ;;  %vm405_vm15 = vcmp.lt.s32.totalorder %v1054_v15, 15  ;;  %vm1092_vm0 = vcmp.eq.s32.totalorder %v298_v46, 1  ;;  %v376_v60 = vrot.slane %v368_v50, %v1065_v19 }
  0x44   : > { %339 = vrot.lane.b32.xlu1 %v323_v5, %s902_s8  ;;  %vm233_vm2 = vcmp.eq.s32.totalorder %v228_v47, 1  ;;  %v438_v63 = vsel %vm405_vm15, 1, %v901_v1  ;;  %vm388_vm4 = vcmask 1039360  }
  0x45   : > { %269 = vrot.lane.b32.xlu0 %v323_v5, %s903_s10 }
  0x48   : > { %242 = vrot.lane.b32.xlu1 %v220_v7, %s904_s26 }
  0x49   : > { %271 = vrot.lane.b32.xlu0 %v338_v6, %s903_s10  ;;  %s732_s10 = sshll.u32 %s958_s19, 8  ;;  %s629_s19 = scalar_lea.sflag [#allocation6], %s1042_s7 }
  0x4c   : > { %312 = vrot.lane.b32.xlu1 %v291_v8, %s905_s11 }
  0x4d   : > { %240 = vrot.lane.b32.xlu0 %v338_v6, %s904_s26 }
  0x50   : > { %341 = vrot.lane.b32.xlu1 %v338_v6, %s902_s8  ;;  %s721_s8 = sshll.u32 %s1042_s7, 4 }
  0x51   : > { %310 = vrot.lane.b32.xlu0 %v338_v6, %s905_s11 }
  0x54   : > { %308 = vrot.lane.b32.xlu1 %v323_v5, %s905_s11 }
  0x55   : > { %238 = vrot.lane.b32.xlu0 %v323_v5, %s904_s26  ;;  %v446_v5 = vrot.slane %v438_v63, %v1065_v19  ;;  %s213_s26 = scalar_lea.vmem [#allocation7], %s721_s8 }
  0x56   : > { %s643_s11 = sshll.u32 %s213_s26, 4  ;;  %s1146_s11 = int_to_ptr.vmem [resolvable:$true] %s643_s11 }
  0x57   : > { %p839_p7 = scmp.lt.s32.totalorder %s1146_s11, %s837_s29 }
  0x58   : > { %386 = vrot.lane.b32.xlu1 %v367_v9, %s906_s12 }
  0x59   : > { %384 = vrot.lane.b32.xlu0 %v381_v2, %s906_s12 }
  0x5c   : > { %456 = vrot.lane.b32.xlu1 %v437_v10, %s907_s20  ;;  %v442_v10 = vrot.slane %v438_v63, %v1063_v18 }
  0x5d   : > { %454 = vrot.lane.b32.xlu0 %v381_v2, %s907_s20 }
  0x60   : > { %452 = vrot.lane.b32.xlu1 %v217_v0, %s907_s20 }
  0x61   : > { %382 = vrot.lane.b32.xlu0 %v217_v0, %s906_s12 }
  0x64   : > { %425 = vrot.lane.b32.xlu1 %v404_v11, %s908_s22 }
  0x65   : > { %423 = vrot.lane.b32.xlu0 %v381_v2, %s908_s22 }
  0x68   : > { %492 = vrot.lane.b32.xlu1 %v381_v2, %s909_s23 }
  0x69   : > { %421 = vrot.lane.b32.xlu0 %v217_v0, %s908_s22  ;;  %s1144_s22 = scalar_lea.hbm %s1192_s4, %s732_s10 }
  0x6c   : > { %490 = vrot.lane.b32.xlu1 %v217_v0, %s909_s23 }
  0x6d   : > { %494 = vrot.lane.b32.xlu0 %v474_v12, %s909_s23  ;;  %v372_v12 = vrot.slane %v368_v50, %v1063_v18  ;;  %s832_s23 = scalar_lea.vmem %s1146_s11, 256 }
  0x6e   : > { %p833_p6 = scmp.ne.s32.totalorder %s1146_s11, %s832_s23  ;;  %p840_p10 = scmp.lt.s32.totalorder %s838_s30, %s832_s23 }
  0x70   : > { %p834_p12 = pnand %p833_p6, %p1205_p11  ;;  %p841_p2 = por %p840_p10, %p839_p7 }
  0x72   : > { %p835_p13 = pneg %p834_p12 }
  0x74   : > { %p842_p4 = pnand %p841_p2, %p835_p13 }
  0xb2   : > { %v344_v20 = vpop.permute.xlu1 %343 }
  0xb3   : > { %v274_v21 = vpop.permute.xlu0 %273 }
  0xb6   : > { %v340_v26 = vpop.permute.xlu1 %339 }
  0xb7   : > { %v270_v27 = vpop.permute.xlu0 %269 }
  0xba   : > { %v243_v31 = vpop.permute.xlu1 %242 }
  0xbb   : > { %v272_v30 = vpop.permute.xlu0 %271 }
  0xbc   : > { %v276_v33 = vsel %vm275_vm5, %v270_v27, %v272_v30  ;;  %v277_v34 = vsel %vm275_vm5, %v272_v30, %v274_v21  ;;  %vm378_vm5 = vcmp.eq.s32.totalorder %v376_v60, 1 }
  0xbd   : > { %v280_v35 = vsel %vm264_vm6, %v276_v33, 0.0  ;;  %v281_v36 = vsel %vm265_vm7, %v277_v34, 0.0  ;;  %vm406_vm6 = vmand %vm405_vm15, %vm222_vm1  ;;  %vm458_vm7 = vcmask 916480   ;;  %vm1114_vm1 = vcmp.eq.s32.totalorder %v442_v10, 1 }
  0xbe   : > { %v284_v38 = vrot.slane %v280_v35, 4  ;;  %v285_v39 = vrot.slane %v281_v36, 4  ;;  %v313_v42 = vpop.permute.xlu1 %312  ;;  %v407_v21 = vsel %vm406_vm6, 1, %v901_v1 }
  0xbf   : > { %v241_v43 = vpop.permute.xlu0 %240  ;;  %v415_v30 = vrot.slane %v407_v21, %v1065_v19 }
  0xc0   : > { %288 = vst [vmem:[#allocation3] sm:$0xf0] %v284_v38  ;;  %289 = vst [vmem:[#allocation3 + $0x8] sm:$0xf0] %v285_v39  ;;  %v246_v44 = vsel %vm244_vm8, %v241_v43, %v243_v31  ;;  %v411_v39 = vrot.slane %v407_v21, %v1063_v18 }
  0xc1   : > { %v250_v45 = vsel %vm234_vm9, %v246_v44, 0.0  ;;  %vm377_vm9 = vcmp.eq.s32.totalorder %v372_v12, 1 }
  0xc2   : > { %252 = vst [vmem:[#allocation3 + $0x8] sm:$0xf] %v250_v45  ;;  %v342_v48 = vpop.permute.xlu1 %341 }
  0xc3   : > { %v311_v49 = vpop.permute.xlu0 %310  ;;  %v346_v51 = vsel %vm345_vm10, %v340_v26, %v342_v48  ;;  %v347_v52 = vsel %vm345_vm10, %v342_v48, %v344_v20  ;;  %vm475_vm10 = vmand %vm405_vm15, %vm292_vm3  ;;  %vm416_vm3 = vcmp.eq.s32.totalorder %v411_v39, 1 }
  0xc4   : > { %v316_v53 = vsel %vm314_vm11, %v311_v49, %v313_v42  ;;  %v350_v54 = vsel %vm334_vm12, %v346_v51, 0.0  ;;  %v351_v55 = vsel %vm335_vm13, %v347_v52, 0.0  ;;  %vm417_vm12 = vcmp.eq.s32.totalorder %v415_v30, 1 }
  0xc5   : > { %v320_v56 = vsel %vm304_vm14, %v316_v53, 0.0  ;;  %v354_v58 = vrot.slane %v350_v54, 4  ;;  %v355_v59 = vrot.slane %v351_v55, 4  ;;  %v476_v42 = vsel %vm475_vm10, 1, %v901_v1 }
  0xc6   : > { %322 = vst [vmem:[#allocation3 + $0x18] sm:$0xf] %v320_v56  ;;  %v309_v61 = vpop.permute.xlu1 %308  ;;  %v484_v44 = vrot.slane %v476_v42, %v1065_v19  ;;  %vm496_vm13 = vcmask 908288  }
  0xc7   : > { %v239_v62 = vpop.permute.xlu0 %238  ;;  %358 = vst [vmem:[#allocation3 + $0x10] sm:$0xf0] %v354_v58  ;;  %359 = vst [vmem:[#allocation3 + $0x18] sm:$0xf0] %v355_v59  ;;  %v315_v0 = vsel %vm314_vm11, %v309_v61, %v311_v49  ;;  %vm427_vm11 = vcmask 924672   ;;  %v515_v59 = vld [vmem:[%s1189_s1] sm:$0xff] }
  0xc8   : > { %v245_v2 = vsel %vm244_vm8, %v239_v62, %v241_v43  ;;  %v319_v3 = vsel %vm1092_vm0, %v315_v0, 0.0  ;;  %vm448_vm8 = vcmp.eq.s32.totalorder %v446_v5, 1  ;;  %v480_v43 = vrot.slane %v476_v42, %v1063_v18  ;;  %v614_v0 = vld [vmem:[%s1190_s2] sm:$0xff] }
  0xc9   : > { %v249_v4 = vsel %vm233_vm2, %v245_v2, 0.0  ;;  %321 = vst [vmem:[#allocation3 + $0x10] sm:$0xf] %v319_v3  ;;  %v506_v17 = vld [vmem:[#allocation3 + $0x8] sm:$0xff]  ;;  %vm486_vm15 = vcmp.eq.s32.totalorder %v484_v44, 1  ;;  %vm520_vm0 = vcmask 1043456  }
  0xca   : > { %251 = vst [vmem:[#allocation3] sm:$0xf] %v249_v4  ;;  %v387_v6 = vpop.permute.xlu1 %386  ;;  %vm485_vm14 = vcmp.eq.s32.totalorder %v480_v43, 1  ;;  %vm516_vm2 = vcmask 293888  }
  0xcb   : > { %v385_v7 = vpop.permute.xlu0 %384 }
  0xcc   : > { %v390_v8 = vsel %vm388_vm4, %v385_v7, %v387_v6 }
  0xcd   : > { %v394_v9 = vsel %vm378_vm5, %v390_v8, 0.0 }
  0xce   : > { %v398_v11 = vrot.slane %v394_v9, 4  ;;  %v457_v13 = vpop.permute.xlu1 %456  ;;  %v508_v20 = vld [vmem:[#allocation3 + $0x18] sm:$0xff] }
  0xcf   : > { %v455_v14 = vpop.permute.xlu0 %454  ;;  %v733_v23 = vpack.c.bf16 %v508_v20, %v506_v17 }
  0xd0   : > { %402 = vst [vmem:[#allocation3 + $0x28] sm:$0xf0] %v398_v11  ;;  %v460_v22 = vsel %vm458_vm7, %v455_v14, %v457_v13  ;;  %v507_v27 = vld [vmem:[#allocation3 + $0x10] sm:$0xff] }
  0xd1   : > { %v464_v24 = vsel %vm448_vm8, %v460_v22, 0.0  ;;  %v505_v26 = vld [vmem:[#allocation3] sm:$0xff]  ;;  %734 = vmatprep.subr.bf16.mxu0 %v733_v23 }
  0xd2   : > { %v468_v28 = vrot.slane %v464_v24, 4  ;;  %v735_v29 = vpack.c.bf16 %v507_v27, %v505_v26  ;;  %v453_v31 = vpop.permute.xlu1 %452 }
  0xd3   : > { %v383_v32 = vpop.permute.xlu0 %382  ;;  %v459_v33 = vsel %vm458_vm7, %v453_v31, %v455_v14 }
  0xd4   : > { %472 = vst [vmem:[#allocation3 + $0x38] sm:$0xf0] %v468_v28  ;;  %v389_v34 = vsel %vm388_vm4, %v383_v32, %v385_v7  ;;  %736 = vmatpush1.bf16.msra.mxu0 %v735_v29  ;;  %v463_v35 = vsel %vm1114_vm1, %v459_v33, 0.0 }
  0xd5   : > { %v393_v36 = vsel %vm377_vm9, %v389_v34, 0.0  ;;  %v467_v37 = vrot.slane %v463_v35, 4 }
  0xd6   : > { %v397_v38 = vrot.slane %v393_v36, 4  ;;  %v426_v40 = vpop.permute.xlu1 %425 }
  0xd7   : > { %v424_v41 = vpop.permute.xlu0 %423  ;;  %471 = vst [vmem:[#allocation3 + $0x30] sm:$0xf0] %v467_v37  ;;  %v510_v54 = vld [vmem:[#allocation3 + $0x28] sm:$0xff] }
  0xd8   : > { %401 = vst [vmem:[#allocation3 + $0x20] sm:$0xf0] %v397_v38  ;;  %v429_v16 = vsel %vm427_vm11, %v424_v41, %v426_v40 }
  0xd9   : > { %v433_v15 = vsel %vm417_vm12, %v429_v16, 0.0 }
  0xda   : > { %435 = vst [vmem:[#allocation3 + $0x38] sm:$0xf] %v433_v15  ;;  %v493_v45 = vpop.permute.xlu1 %492 }
  0xdb   : > { %v422_v46 = vpop.permute.xlu0 %421 }
  0xdc   : > { %v428_v47 = vsel %vm427_vm11, %v422_v46, %v424_v41 }
  0xdd   : > { %v432_v48 = vsel %vm416_vm3, %v428_v47, 0.0 }
  0xde   : > { %434 = vst [vmem:[#allocation3 + $0x30] sm:$0xf] %v432_v48  ;;  %v491_v1 = vpop.permute.xlu1 %490 }
  0xdf   : > { %v495_v49 = vpop.permute.xlu0 %494  ;;  %v497_v50 = vsel %vm496_vm13, %v491_v1, %v493_v45  ;;  %v509_v19 = vld [vmem:[#allocation3 + $0x20] sm:$0xff] }
  0xe0   : > { %v498_v51 = vsel %vm496_vm13, %v493_v45, %v495_v49  ;;  %v501_v52 = vsel %vm485_vm14, %v497_v50, 0.0 }
  0xe1   : > { %v502_v53 = vsel %vm486_vm15, %v498_v51, 0.0  ;;  %v512_v55 = vld [vmem:[#allocation3 + $0x38] sm:$0xff]  ;;  %503 = vst [vmem:[#allocation3 + $0x40] sm:$0xf] %v501_v52 }
  0xe2   : > { %504 = vst [vmem:[#allocation3 + $0x48] sm:$0xf] %v502_v53  ;;  %v737_v18 = vpack.c.bf16 %v512_v55, %v510_v54 }
  0xe4   : > { %738 = vmatprep.subr.bf16.mxu0 %v737_v18 }
  0xe5   : > { %v511_v56 = vld [vmem:[#allocation3 + $0x30] sm:$0xff] }
  0xe6   : > { %v739_v57 = vpack.c.bf16 %v511_v56, %v509_v19 }
  0xe8   : > { %740 = vmatpush1.bf16.msra.mxu0 %v739_v57  ;;  %v513_v60 = vld [vmem:[#allocation3 + $0x40] sm:$0xf] }
  0xe9   : > { %v514_v58 = vld [vmem:[#allocation3 + $0x48] sm:$0xf] }
  0xea   : > { %723 = vmatprep.subr.msk.mxu0 %vm520_vm0, %v514_v58 }
  0xec   : > { %724 = vmatpush1.msk.msra.mxu0 %vm520_vm0, %v513_v60 }
  0xed   : > { %725 = vmatmul.mubr.msk.f32.vlgmr.msra.gmra.mrb[0].mxu0 %vm516_vm2, %v515_v59 }
 0x1c0   : > { %v593_v61 = vpop.f32.mrb[0].mxu0 }
 0x1c1   : > { %v595_v62 = vpop.f32.mrb[1].mxu0 }
 0x1c2   : > { %v598_v63 = vadd.f32 %v595_v62, %v593_v61 }
 0x1c4   : > { %599 = vadd.xlane.f32.xlu0 %v598_v63 }
 0x1da   : > { %619 = vperm.xlu0 %797, %v614_v0  }
 0x251   : > { %v600_v2 = vpop.xlane.xlu0 %599 }
 0x252   : > { %v601_v3 = vmul.f32 0.00390625, %v600_v2 }
 0x254   : > { %v602_v4 = vsub.f32 %v593_v61, %v601_v3  ;;  %v603_v5 = vsub.f32 %v595_v62, %v601_v3 }
 0x256   : > { %v604_v6 = vmul.f32 %v602_v4, %v602_v4  ;;  %v605_v7 = vmul.f32 %v603_v5, %v603_v5 }
 0x258   : > { %v606_v8 = vadd.f32 %v605_v7, %v604_v6 }
 0x259   : > { %v620_v13 = vpop.permute.xlu0 %619 }
 0x25a   : > { %607 = vadd.xlane.f32.xlu1 %v606_v8 }
 0x2e7   : > { %v608_v9 = vpop.xlane.xlu1 %607 }
 0x2e8   : > { %v609_v10 = vmul.f32 0.00390625, %v608_v9 }
 0x2ea   : > { %v610_v11 = vadd.f32 1e-05, %v609_v10 }
 0x2ec   : > { %800 = vrsqrt.f32 %v610_v11 }
 0x2f6   : > { %v801_v12 = vpop.eup %800 }
 0x2f7   : > { %v612_v14 = vmul.f32 %v801_v12, %v602_v4  ;;  %v613_v17 = vmul.f32 %v801_v12, %v603_v5 }
 0x2f9   : > { %vm615_vm4 = vcmp.ge.f32.partialorder %v612_v14, 0.0  ;;  %vm616_vm5 = vcmp.ge.f32.partialorder %v613_v17, 0.0  ;;  %v622_v20 = vmul.f32 %v620_v13, %v612_v14  ;;  %v623_v21 = vmul.f32 %v620_v13, %v613_v17 }
 0x2fb   : > { %v624_v22 = vsel %vm615_vm4, %v612_v14, %v622_v20  ;;  %v625_v23 = vsel %vm616_vm5, %v613_v17, %v623_v21 }
 0x2fc   : > { %626 = vst [vmem:[%s213_s26] sm:$0xff] %v624_v22  ;;  %627 = vst [vmem:[%s213_s26 + $0x8] sm:$0xff] %v625_v23 }
 0x2fd   : > { %845 = shalt.err (!%p842_p4)
}
 0x2fe   : > { %s846_s7 = scalar_lea.hbm %s1144_s22, 256  ;;  %s850_s9 = scalar_lea.hbm %s1192_s4, 512 }
 0x2ff   : > { %p847_p5 = scmp.ne.s32.totalorder %s1144_s22, %s846_s7  ;;  %p851_p0 = scmp.lt.u32.totalorder %s1144_s22, %s1192_s4 }
 0x300   : > { %p852_p1 = scmp.lt.u32.totalorder %s850_s9, %s846_s7  ;;  %p854_p6 = scmp.lt.u32.totalorder %s846_s7, %s1144_s22 }
 0x301   : > { %p848_p8 = pnand %p847_p5, %p1205_p11 }
 0x302   : > { %p853_p3 = por %p852_p1, %p851_p0 }
 0x303   : > { %p849_p9 = pneg %p848_p8 }
 0x304   : > { %p855_p12 = por %p854_p6, %p853_p3 }
 0x306   : > { %p856_p13 = pnand %p855_p12, %p849_p9 }
 0x308   : > { %859 = shalt.err (!%p856_p13)
}
 0x309   : > { %743 = dma.vmem_to_hbm [thread:$0]  (%p1205_p11), %s1146_s11, 256, %s1144_s22, %s629_s19  }
 0x30a PF: > { %s655_s8 = sand.u32 1, %s886_s15   ;;  %p1206_p7 = scmp.ne.s32.totalorder %s1197_s28, 0 }
 0x30b   : > { %p1207_p10 = scmp.ge.s32.totalorder %s898_s18, 2  ;;  %s656_s10 = scalar_lea.sflag [#allocation6], %s655_s8 }
 0x30d   : > { %p750_p2 = pnand %p1207_p10, %p1206_p7 }
 0x30f   : > { %881 = dma.done.wait (!%p750_p2), %s656_s10, 256  }
 0x310   : > { %883 = vsyncadd (!%p750_p2), %s656_s10, 4294967040  ;;  %p17_p4 = scmp.ge.s32.totalorder %s962_s21, 4   ;;  %s1208_s15 = smov %s890_s16 }
 0x311   : > { %s1209_s16 = smov %s894_s17  ;;  %s1210_s17 = smov %s974_s24 }
 0x312   : > { %s1211_s18 = smov %s962_s21  ;;  %19 = sbr.rel (!%p17_p4) target bundleno = 5 (0x5), region = 82 }
 0x319   :  { %661 = vsyncpa [#allocation5], 1 }
 0x31a   :  { %663 = vsyncpa [#allocation5 + $0x1], 1 }
 0x31b   :  { %664 = vsyncpa [#allocation6], 1 }
 0x31c   :  { %666 = vsyncpa [#allocation6 + $0x1], 1 }

</bundles_post_ra>
